<compile_context>
chip_gen: v7x
topology: tpu7x:2x2x1
jax: 0.10.0
libtpu: 0.0.40
codegen_flags: <defaults>
</compile_context>

<pallas_src>
import functools
import math

import jax
import jax.numpy as jnp
from jax.experimental import pallas as pl
from jax.experimental.pallas import tpu as pltpu

_EPS = 1e-5  # nn.LayerNorm default eps
_INV_SQRT2 = 1.0 / math.sqrt(2.0)
_SQRT_2_OVER_PI = math.sqrt(2.0 / math.pi)


def _round_up(x, m):
    return ((x + m - 1) // m) * m


@functools.lru_cache(maxsize=1)
def _vmem_budget_bytes():
    """Physical VMEM per TensorCore minus headroom for compiler scratch / spills."""
    cap = 64 * 1024 * 1024  # conservative default (v7x-sized) if the query fails
    try:
        info = pltpu.get_tpu_info()
        cap = int(getattr(info, "vmem_capacity_bytes", cap) or cap)
    except Exception:
        pass
    # ~84% of physical: ~53 MiB on v7x (64 MiB/TC), ~107 MiB on v5e/v6e (128 MiB).
    return max(32 * 1024 * 1024, int(cap * 0.84))


def _layer_norm_f32(x_f32, gamma_f32, beta_f32, true_dim):
    """LayerNorm in f32; statistics are computed over the first `true_dim` lanes only
    (feature padding is zero and gamma/beta padding is zero, so padded outputs are 0)."""
    dim_p = x_f32.shape[-1]
    inv_dim = 1.0 / float(true_dim)
    mean = jnp.sum(x_f32, axis=-1, keepdims=True) * inv_dim
    centered = x_f32 - mean
    if dim_p != true_dim:
        lane = jax.lax.broadcasted_iota(jnp.int32, x_f32.shape, x_f32.ndim - 1)
        centered_valid = jnp.where(lane < true_dim, centered, 0.0)
    else:
        centered_valid = centered
    var = jnp.sum(centered_valid * centered_valid, axis=-1, keepdims=True) * inv_dim
    return centered * jax.lax.rsqrt(var + _EPS) * gamma_f32 + beta_f32


def _gelu_f32(h, approx):
    if approx:
        # tanh-approximate GELU runs on the EUP (opt-in; changes numerics slightly).
        return 0.5 * h * (1.0 + jnp.tanh(_SQRT_2_OVER_PI * (h + 0.044715 * h * h * h)))
    # Exact erf formulation (PyTorch nn.GELU default).
    return 0.5 * h * (1.0 + jax.lax.erf(h * _INV_SQRT2))


def _ff_fused_kernel(x_ref, g_ref, b_ref, w1_ref, b1_ref, w2_ref, b2_ref, o_ref,
                     *, true_dim, compute_dtype, approx_gelu):
    """Both dim x dim weights resident in VMEM; one row-tile per grid step."""
    y = _layer_norm_f32(x_ref[...].astype(jnp.float32),
                        g_ref[...].astype(jnp.float32),
                        b_ref[...].astype(jnp.float32), true_dim)
    # Weights are pre-transposed to (in, out) in the wrapper -> plain contraction,
    # f32 accumulation on the MXU.
    h = jnp.dot(y.astype(compute_dtype), w1_ref[...],
                preferred_element_type=jnp.float32) + b1_ref[...].astype(jnp.float32)
    h = _gelu_f32(h, approx_gelu)
    out = jnp.dot(h.astype(compute_dtype), w2_ref[...],
                  preferred_element_type=jnp.float32) + b2_ref[...].astype(jnp.float32)
    o_ref[...] = out.astype(o_ref.dtype)


def _ff_hidden_tiled_kernel(x_ref, g_ref, b_ref, w1_ref, b1_ref, w2_ref, b2_ref, o_ref,
                            y_ref, acc_ref, *, true_dim, compute_dtype, approx_gelu):
    """Reduction-grid fallback: hidden dim tiled; W1/W2 streamed in slices,
    LayerNorm output cached in VMEM scratch, f32 accumulator across k."""
    k = pl.program_id(1)

    @pl.when(k == 0)
    def _():
        y = _layer_norm_f32(x_ref[...].astype(jnp.float32),
                            g_ref[...].astype(jnp.float32),
                            b_ref[...].astype(jnp.float32), true_dim)
        y_ref[...] = y.astype(compute_dtype)
        acc_ref[...] = jnp.zeros_like(acc_ref)

    h = jnp.dot(y_ref[...], w1_ref[...],
                preferred_element_type=jnp.float32) + b1_ref[...].astype(jnp.float32)
    h = _gelu_f32(h, approx_gelu)
    acc_ref[...] += jnp.dot(h.astype(compute_dtype), w2_ref[...],
                            preferred_element_type=jnp.float32)

    @pl.when(k == pl.num_programs(1) - 1)
    def _():
        o_ref[...] = (acc_ref[...] + b2_ref[...].astype(jnp.float32)).astype(o_ref.dtype)


@functools.partial(
    jax.jit, static_argnames=("block_rows", "block_k", "compute_dtype", "approx_gelu"))
def feed_forward(x, gamma, beta, w1, b1, w2, b2, *,
                 block_rows=512, block_k=None, compute_dtype=None, approx_gelu=False):
    """x: (batch, seq, dim). w1/w2: PyTorch-style (out, in). Returns (batch, seq, dim).

    compute_dtype: optional matmul dtype (e.g. jnp.bfloat16 for f32 inputs) -> MXU peak
    path; default keeps x's dtype (exact vs. the reference for f32 inputs).
    block_k: force the hidden-dim tiled path with this hidden tile (multiple of 128).
    """
    batch, seq, dim = x.shape
    n = batch * seq
    cdt = jnp.dtype(compute_dtype) if compute_dtype is not None else jnp.dtype(x.dtype)
    isz_x = jnp.dtype(x.dtype).itemsize
    isz_c = cdt.itemsize

    # Lane-dense feature dim (unmasked vst, aligned weight layout).
    dim_p = _round_up(dim, 128)

    # Row tile: large, multiple of 256 (v6e/v7x MXU) to amortize the ~0.35us/step cost.
    tm = min(_round_up(block_rows, 256), _round_up(n, 16))
    n_pad = _round_up(n, tm)

    x2d = x.reshape(n, dim)
    if n_pad != n or dim_p != dim:
        # Zero rows/features are safe through the masked LayerNorm and sliced off.
        x2d = jnp.pad(x2d, ((0, n_pad - n), (0, dim_p - dim)))

    def _vec(v):
        v = v.reshape(1, dim)
        if dim_p != dim:
            v = jnp.pad(v, ((0, 0), (0, dim_p - dim)))
        return v

    gamma2, beta2, b1_2, b2_2 = _vec(gamma), _vec(beta), _vec(b1), _vec(b2)

    def _wt(w):
        # PyTorch (out, in) -> (in, out) ONCE in the wrapper (one dim^2 HBM pass,
        # negligible vs. streaming n x dim) and cast to the matmul dtype so the dot
        # inside the kernel is a plain, untransposed, single-dtype contraction.
        wt = w.T.astype(cdt)
        if dim_p != dim:
            wt = jnp.pad(wt, ((0, dim_p - dim), (0, dim_p - dim)))
        return wt

    w1t, w2t = _wt(w1), _wt(w2)

    budget = _vmem_budget_bytes()
    grid_rows = n_pad // tm

    # Fused-path VMEM plan: x/out double-buffered tiles, SINGLE-buffered resident
    # weights (pl.Buffered(1)), f32 intermediates headroom, tiny vectors.
    io_bytes = 2 * tm * dim_p * (2 * isz_x)
    weight_bytes = 2 * dim_p * dim_p * isz_c
    interm_bytes = 5 * tm * dim_p * 4
    fused_need = io_bytes + weight_bytes + interm_bytes + 8 * dim_p * 4

    cost = pl.CostEstimate(
        flops=2 * 2 * n_pad * dim_p * dim_p,        # two dim x dim matmuls
        transcendentals=n_pad * dim_p,              # erf/tanh in the GELU
        bytes_accessed=2 * n_pad * dim_p * isz_x
        + (2 * dim_p * dim_p + 4 * dim_p) * isz_c,
    )

    kern_kwargs = dict(true_dim=dim, compute_dtype=cdt, approx_gelu=approx_gelu)

    if block_k is None and fused_need <= budget:
        vmem_limit = int(min(budget, max(32 * 1024 * 1024, int(fused_need * 1.25))))
        resident = functools.partial(pl.BlockSpec, pipeline_mode=pl.Buffered(1))
        # TODO(synk): if a trace shows exposed DMA on x in the small-dim regime,
        # deepen the x/out pipeline with pipeline_mode=pl.Buffered(3).
        out2d = pl.pallas_call(
            functools.partial(_ff_fused_kernel, **kern_kwargs),
            out_shape=jax.ShapeDtypeStruct((n_pad, dim_p), x.dtype),
            grid_spec=pltpu.PrefetchScalarGridSpec(
                num_scalar_prefetch=0,
                grid=(grid_rows,),
                in_specs=[
                    pl.BlockSpec((tm, dim_p), lambda i: (i, 0)),      # x rows (streamed)
                    resident((1, dim_p), lambda i: (0, 0)),           # gamma
                    resident((1, dim_p), lambda i: (0, 0)),           # beta
                    resident((dim_p, dim_p), lambda i: (0, 0)),       # W1^T (in, out)
                    resident((1, dim_p), lambda i: (0, 0)),           # b1
                    resident((dim_p, dim_p), lambda i: (0, 0)),       # W2^T (in, out)
                    resident((1, dim_p), lambda i: (0, 0)),           # b2
                ],
                out_specs=pl.BlockSpec((tm, dim_p), lambda i: (i, 0)),
            ),
            compiler_params=pltpu.CompilerParams(
                dimension_semantics=("parallel",),
                vmem_limit_bytes=vmem_limit,
            ),
            cost_estimate=cost,
        )(x2d, gamma2, beta2, w1t, b1_2, w2t, b2_2)
    else:
        # Hidden-dim tiled (reduction-grid) path for large dim / small VMEM (v7x).
        # TODO(synk): on v7x, additionally split the hidden/output dim across the two
        # TensorCores instead of row-sharding (avoids duplicating streamed weights).
        resident_bytes = (2 * tm * dim_p * (2 * isz_x)        # x/out double-buffered
                          + tm * dim_p * (4 + isz_c)          # acc + y scratch
                          + 4 * tm * dim_p * 4)               # f32 intermediates
        if block_k is not None:
            tk = min(_round_up(block_k, 128), dim_p)
        else:
            tk = (budget - resident_bytes) // (4 * dim_p * isz_c)  # 2 slices, 2 buffers
            tk = max(128, min(dim_p, (tk // 128) * 128))
        while dim_p % tk != 0:
            tk -= 128
        tiled_need = resident_bytes + 4 * dim_p * tk * isz_c + 8 * dim_p * 4
        vmem_limit = int(min(budget, max(32 * 1024 * 1024, int(tiled_need * 1.25))))
        out2d = pl.pallas_call(
            functools.partial(_ff_hidden_tiled_kernel, **kern_kwargs),
            out_shape=jax.ShapeDtypeStruct((n_pad, dim_p), x.dtype),
            grid_spec=pltpu.PrefetchScalarGridSpec(
                num_scalar_prefetch=0,
                grid=(grid_rows, dim_p // tk),
                in_specs=[
                    pl.BlockSpec((tm, dim_p), lambda i, k: (i, 0)),   # x rows
                    pl.BlockSpec((1, dim_p), lambda i, k: (0, 0)),    # gamma
                    pl.BlockSpec((1, dim_p), lambda i, k: (0, 0)),    # beta
                    pl.BlockSpec((dim_p, tk), lambda i, k: (0, k)),   # W1^T slice
                    pl.BlockSpec((1, tk), lambda i, k: (0, k)),       # b1 slice
                    pl.BlockSpec((tk, dim_p), lambda i, k: (k, 0)),   # W2^T slice
                    pl.BlockSpec((1, dim_p), lambda i, k: (0, 0)),    # b2
                ],
                out_specs=pl.BlockSpec((tm, dim_p), lambda i, k: (i, 0)),
                scratch_shapes=[
                    pltpu.VMEM((tm, dim_p), cdt),          # cached LayerNorm output
                    pltpu.VMEM((tm, dim_p), jnp.float32),  # output accumulator
                ],
            ),
            compiler_params=pltpu.CompilerParams(
                dimension_semantics=("parallel", "arbitrary"),
                vmem_limit_bytes=vmem_limit,
            ),
            cost_estimate=cost,
        )(x2d, gamma2, beta2, w1t, b1_2, w2t, b2_2)

    return out2d[:n, :dim].reshape(batch, seq, dim)


def _reference(x, gamma, beta, w1, b1, w2, b2):
    """Pure-JAX reference mirroring the PyTorch module."""
    xf = x.astype(jnp.float32)
    mean = jnp.mean(xf, axis=-1, keepdims=True)
    var = jnp.mean((xf - mean) ** 2, axis=-1, keepdims=True)
    y = (xf - mean) / jnp.sqrt(var + _EPS) * gamma + beta
    h = y @ w1.T + b1
    h = 0.5 * h * (1.0 + jax.lax.erf(h * _INV_SQRT2))
    return (h @ w2.T + b2).astype(x.dtype)


def _make_params(key, dim, dtype=jnp.float32):
    k_w1, k_b1, k_w2, k_b2 = jax.random.split(key, 4)
    bound = 1.0 / math.sqrt(dim)
    gamma = jnp.ones((dim,), dtype)
    beta = jnp.zeros((dim,), dtype)
    w1 = jax.random.uniform(k_w1, (dim, dim), dtype, -bound, bound)
    b1 = jax.random.uniform(k_b1, (dim,), dtype, -bound, bound)
    w2 = jax.random.uniform(k_w2, (dim, dim), dtype, -bound, bound)
    b2 = jax.random.uniform(k_b2, (dim,), dtype, -bound, bound)
    return gamma, beta, w1, b1, w2, b2


if __name__ == "__main__":
    key = jax.random.PRNGKey(0)
    batch, seq, dim = 2, 8, 128   # dim=128 -> lane-dense tiles

    # 1) Main case: fused resident-weight path, exact f32.
    k_x, k_p = jax.random.split(key)
    x = jax.random.normal(k_x, (batch, seq, dim), dtype=jnp.float32)
    params = _make_params(k_p, dim)
    out = jax.block_until_ready(feed_forward(x, *params))
    ref = _reference(x, *params)
    assert out.shape == (batch, seq, dim)
    assert jnp.allclose(out, ref, atol=2e-3, rtol=2e-3), "fused path mismatch"

    # 2) Opt-in bf16 matmul path (loose tolerance: numerics intentionally differ).
    out_bf = jax.block_until_ready(feed_forward(x, *params, compute_dtype=jnp.bfloat16))
    assert jnp.allclose(out_bf, ref, atol=1e-1, rtol=1e-1), "bf16 compute path mismatch"

    # 3) Non-multiple-of-128 feature dim (wrapper pads to lane-dense, masks LN stats).
    dim2 = 96
    k_x2, k_p2 = jax.random.split(jax.random.PRNGKey(1))
    x2 = jax.random.normal(k_x2, (batch, seq, dim2), dtype=jnp.float32)
    params2 = _make_params(k_p2, dim2)
    out2 = jax.block_until_ready(feed_forward(x2, *params2))
    ref2 = _reference(x2, *params2)
    assert jnp.allclose(out2, ref2, atol=2e-3, rtol=2e-3), "padded-dim path mismatch"

    # 4) Hidden-dim tiled (reduction-grid) fallback, forced at a small size.
    dim3 = 256
    k_x3, k_p3 = jax.random.split(jax.random.PRNGKey(2))
    x3 = jax.random.normal(k_x3, (batch, seq, dim3), dtype=jnp.float32)
    params3 = _make_params(k_p3, dim3)
    out3 = jax.block_until_ready(feed_forward(x3, *params3, block_k=128))
    ref3 = _reference(x3, *params3)
    assert jnp.allclose(out3, ref3, atol=2e-3, rtol=2e-3), "hidden-tiled path mismatch"

    print("KERNEL_OK")
</pallas_src>

<mosaic_0001>
module attributes {stable_mosaic.version = 11 : i64} {
  func.func @_ff_fused_kernel(%arg0: i32, %arg1: memref<16x128xf32, #tpu.memory_space<vmem>>, %arg2: memref<1x128xf32, #tpu.memory_space<vmem>>, %arg3: memref<1x128xf32, #tpu.memory_space<vmem>>, %arg4: memref<128x128xf32, #tpu.memory_space<vmem>>, %arg5: memref<1x128xf32, #tpu.memory_space<vmem>>, %arg6: memref<128x128xf32, #tpu.memory_space<vmem>>, %arg7: memref<1x128xf32, #tpu.memory_space<vmem>>, %arg8: memref<16x128xf32, #tpu.memory_space<vmem>>) attributes {dimension_semantics = [#tpu.dimension_semantics<parallel>], iteration_bounds = array<i64: 1>, scalar_prefetch = 0 : i64, scratch_operands = 0 : i64, tpu.core_type = #tpu.core_type<tc>, window_params = [{transform_indices = @transform_0, window_bounds = array<i64: 16, 128>}, {pipeline_mode = #tpu.pipeline_mode<synchronous>, transform_indices = @transform_1, window_bounds = array<i64: 1, 128>}, {pipeline_mode = #tpu.pipeline_mode<synchronous>, transform_indices = @transform_2, window_bounds = array<i64: 1, 128>}, {pipeline_mode = #tpu.pipeline_mode<synchronous>, transform_indices = @transform_3, window_bounds = array<i64: 128, 128>}, {pipeline_mode = #tpu.pipeline_mode<synchronous>, transform_indices = @transform_4, window_bounds = array<i64: 1, 128>}, {pipeline_mode = #tpu.pipeline_mode<synchronous>, transform_indices = @transform_5, window_bounds = array<i64: 128, 128>}, {pipeline_mode = #tpu.pipeline_mode<synchronous>, transform_indices = @transform_6, window_bounds = array<i64: 1, 128>}, {transform_indices = @transform_7, window_bounds = array<i64: 16, 128>}]} {
    %c0 = arith.constant 0 : index
    %c0_0 = arith.constant 0 : index
    %0 = vector.load %arg1[%c0, %c0_0] : memref<16x128xf32, #tpu.memory_space<vmem>>, vector<16x128xf32>
    %c0_1 = arith.constant 0 : index
    %c0_2 = arith.constant 0 : index
    %1 = vector.load %arg2[%c0_1, %c0_2] : memref<1x128xf32, #tpu.memory_space<vmem>>, vector<1x128xf32>
    %c0_3 = arith.constant 0 : index
    %c0_4 = arith.constant 0 : index
    %2 = vector.load %arg3[%c0_3, %c0_4] : memref<1x128xf32, #tpu.memory_space<vmem>>, vector<1x128xf32>
    %cst = arith.constant dense<0.000000e+00> : vector<16xf32>
    %3 = vector.multi_reduction <add>, %0, %cst [1] : vector<16x128xf32> to vector<16xf32>
    %4 = vector.shape_cast %3 : vector<16xf32> to vector<16x1xf32>
    %cst_5 = arith.constant 7.812500e-03 : f32
    %5 = vector.broadcast %cst_5 : f32 to vector<16x1xf32>
    %6 = arith.mulf %4, %5 : vector<16x1xf32>
    %7 = vector.broadcast %6 : vector<16x1xf32> to vector<16x128xf32>
    %8 = arith.subf %0, %7 : vector<16x128xf32>
    %9 = arith.mulf %8, %8 : vector<16x128xf32>
    %cst_6 = arith.constant dense<0.000000e+00> : vector<16xf32>
    %10 = vector.multi_reduction <add>, %9, %cst_6 [1] : vector<16x128xf32> to vector<16xf32>
    %11 = vector.shape_cast %10 : vector<16xf32> to vector<16x1xf32>
    %cst_7 = arith.constant 7.812500e-03 : f32
    %12 = vector.broadcast %cst_7 : f32 to vector<16x1xf32>
    %13 = arith.mulf %11, %12 : vector<16x1xf32>
    %cst_8 = arith.constant 9.99999974E-6 : f32
    %14 = vector.broadcast %cst_8 : f32 to vector<16x1xf32>
    %15 = arith.addf %13, %14 : vector<16x1xf32>
    %16 = math.rsqrt %15 : vector<16x1xf32>
    %17 = vector.broadcast %16 : vector<16x1xf32> to vector<16x128xf32>
    %18 = arith.mulf %8, %17 : vector<16x128xf32>
    %19 = vector.broadcast %1 : vector<1x128xf32> to vector<16x128xf32>
    %20 = arith.mulf %18, %19 : vector<16x128xf32>
    %21 = vector.broadcast %2 : vector<1x128xf32> to vector<16x128xf32>
    %22 = arith.addf %20, %21 : vector<16x128xf32>
    %c0_9 = arith.constant 0 : index
    %c0_10 = arith.constant 0 : index
    %23 = vector.load %arg4[%c0_9, %c0_10] : memref<128x128xf32, #tpu.memory_space<vmem>>, vector<128x128xf32>
    %cst_11 = arith.constant dense<0.000000e+00> : vector<16x128xf32>
    %24 = tpu.matmul %22, %23, %cst_11 {dimension_numbers = #tpu.dot_dimension_numbers<[1], [0], [0], [1], [0, 0, 1, 1], [], []>} : vector<16x128xf32>, vector<128x128xf32>, vector<16x128xf32> -> vector<16x128xf32>
    %c0_12 = arith.constant 0 : index
    %c0_13 = arith.constant 0 : index
    %25 = vector.load %arg5[%c0_12, %c0_13] : memref<1x128xf32, #tpu.memory_space<vmem>>, vector<1x128xf32>
    %26 = vector.broadcast %25 : vector<1x128xf32> to vector<16x128xf32>
    %27 = arith.addf %24, %26 : vector<16x128xf32>
    %cst_14 = arith.constant 5.000000e-01 : f32
    %28 = vector.broadcast %cst_14 : f32 to vector<16x128xf32>
    %29 = arith.mulf %28, %27 : vector<16x128xf32>
    %cst_15 = arith.constant 0.707106769 : f32
    %30 = vector.broadcast %cst_15 : f32 to vector<16x128xf32>
    %31 = arith.mulf %27, %30 : vector<16x128xf32>
    %32 = math.erf %31 : vector<16x128xf32>
    %cst_16 = arith.constant 1.000000e+00 : f32
    %33 = vector.broadcast %cst_16 : f32 to vector<16x128xf32>
    %34 = arith.addf %33, %32 : vector<16x128xf32>
    %35 = arith.mulf %29, %34 : vector<16x128xf32>
    %c0_17 = arith.constant 0 : index
    %c0_18 = arith.constant 0 : index
    %36 = vector.load %arg6[%c0_17, %c0_18] : memref<128x128xf32, #tpu.memory_space<vmem>>, vector<128x128xf32>
    %cst_19 = arith.constant dense<0.000000e+00> : vector<16x128xf32>
    %37 = tpu.matmul %35, %36, %cst_19 {dimension_numbers = #tpu.dot_dimension_numbers<[1], [0], [0], [1], [0, 0, 1, 1], [], []>} : vector<16x128xf32>, vector<128x128xf32>, vector<16x128xf32> -> vector<16x128xf32>
    %c0_20 = arith.constant 0 : index
    %c0_21 = arith.constant 0 : index
    %38 = vector.load %arg7[%c0_20, %c0_21] : memref<1x128xf32, #tpu.memory_space<vmem>>, vector<1x128xf32>
    %39 = vector.broadcast %38 : vector<1x128xf32> to vector<16x128xf32>
    %40 = arith.addf %37, %39 : vector<16x128xf32>
    %c0_22 = arith.constant 0 : index
    %c0_23 = arith.constant 0 : index
    %41 = vector.load %arg8[%c0_22, %c0_23] : memref<16x128xf32, #tpu.memory_space<vmem>>, vector<16x128xf32>
    tpu.vector_store %arg8[%c0_22, %c0_23], %40 {strides = array<i32>} : memref<16x128xf32, #tpu.memory_space<vmem>>, vector<16x128xf32>,
    return
  }
  func.func @transform_0(%arg0: i32) -> (i32, i32) {
    %c0_i32 = arith.constant 0 : i32
    %c0_i32_0 = arith.constant 0 : i32
    return %arg0, %c0_i32 : i32, i32
  }
  func.func @transform_1(%arg0: i32) -> (i32, i32) {
    %c0_i32 = arith.constant 0 : i32
    %c0_i32_0 = arith.constant 0 : i32
    %c0_i32_1 = arith.constant 0 : i32
    return %c0_i32, %c0_i32_0 : i32, i32
  }
  func.func @transform_2(%arg0: i32) -> (i32, i32) {
    %c0_i32 = arith.constant 0 : i32
    %c0_i32_0 = arith.constant 0 : i32
    %c0_i32_1 = arith.constant 0 : i32
    return %c0_i32, %c0_i32_0 : i32, i32
  }
  func.func @transform_3(%arg0: i32) -> (i32, i32) {
    %c0_i32 = arith.constant 0 : i32
    %c0_i32_0 = arith.constant 0 : i32
    %c0_i32_1 = arith.constant 0 : i32
    return %c0_i32, %c0_i32_0 : i32, i32
  }
  func.func @transform_4(%arg0: i32) -> (i32, i32) {
    %c0_i32 = arith.constant 0 : i32
    %c0_i32_0 = arith.constant 0 : i32
    %c0_i32_1 = arith.constant 0 : i32
    return %c0_i32, %c0_i32_0 : i32, i32
  }
  func.func @transform_5(%arg0: i32) -> (i32, i32) {
    %c0_i32 = arith.constant 0 : i32
    %c0_i32_0 = arith.constant 0 : i32
    %c0_i32_1 = arith.constant 0 : i32
    return %c0_i32, %c0_i32_0 : i32, i32
  }
  func.func @transform_6(%arg0: i32) -> (i32, i32) {
    %c0_i32 = arith.constant 0 : i32
    %c0_i32_0 = arith.constant 0 : i32
    %c0_i32_1 = arith.constant 0 : i32
    return %c0_i32, %c0_i32_0 : i32, i32
  }
  func.func @transform_7(%arg0: i32) -> (i32, i32) {
    %c0_i32 = arith.constant 0 : i32
    %c0_i32_0 = arith.constant 0 : i32
    return %arg0, %c0_i32 : i32, i32
  }
}

</mosaic_0001>

<bundles_post_ra>
// kernel: feed_forward.1
= control target key start
LH: loop header
LB: loop body
LE: loop exit
PB: predicated region body
PF: predicated region fallthrough
CT: control target
= control target key end

     0   :  { %s681_s0 = inlined_call_operand.vmem [shape: f32[16,128], index: 0, kind: input, shape index: {}]   ;;  %s682_s1 = inlined_call_operand.vmem [shape: f32[1,128], index: 1, kind: input, shape index: {}]   ;;  %s683_s2 = inlined_call_operand.vmem [shape: f32[1,128], index: 2, kind: input, shape index: {}]   ;;  %s684_s3 = inlined_call_operand.vmem [shape: f32[128,128], index: 3, kind: input, shape index: {}]   ;;  %s685_s4 = inlined_call_operand.vmem [shape: f32[1,128], index: 4, kind: input, shape index: {}]   ;;  %s686_s5 = inlined_call_operand.vmem [shape: f32[128,128], index: 5, kind: input, shape index: {}]   ;;  %s687_s6 = inlined_call_operand.vmem [shape: f32[1,128], index: 6, kind: input, shape index: {}]   ;;  %s688_s7 = inlined_call_operand.hbm [shape: f32[16,128], index: 7, kind: output, shape index: {}]  }
   0x1   :  { %v27_v0 = vld [vmem:[%s681_s0] sm:$0xff] }
   0x2   :  { %12 = vsyncpa [#allocation3], 0  ;;  %31 = vadd.xlane.f32.xlu0 %v27_v0  ;;  %v28_v1 = vld [vmem:[%s681_s0 + $0x8] sm:$0xff]  ;;  %v69_v2 = vld [vmem:[%s684_s3] sm:$0xff]  ;;  %s502_s22 = smov [#allocation2]  }
   0x3   :  { %v70_v3 = vld [vmem:[%s684_s3 + $0x8] sm:$0xff]  ;;  %v71_v4 = vld [vmem:[%s684_s3 + $0x10] sm:$0xff]  ;;  %v72_v6 = vld [vmem:[%s684_s3 + $0x18] sm:$0xff]  ;;  %s282_s23 = sshll.u32 %s502_s22, 4  ;;  %s283_s23 = int_to_ptr.vmem [resolvable:$true] %s282_s23 }
   0x4   :  { %v403_v5 = vpack.c.bf16 %v70_v3, %v69_v2  ;;  %v407_v7 = vpack.c.bf16 %v72_v6, %v71_v4  ;;  %v73_v16 = vld [vmem:[%s684_s3 + $0x20] sm:$0xff]  ;;  %v74_v17 = vld [vmem:[%s684_s3 + $0x28] sm:$0xff]  ;;  %v75_v19 = vld [vmem:[%s684_s3 + $0x30] sm:$0xff]  ;;  %s478_s24 = scalar_lea.vmem %s283_s23, 256  ;;  %p483_p1 = scmp.lt.s32.totalorder %s283_s23, %s283_s23 }
   0x5   :  { %v411_v18 = vpack.c.bf16 %v74_v17, %v73_v16  ;;  %v76_v20 = vld [vmem:[%s684_s3 + $0x38] sm:$0xff]  ;;  %v77_v22 = vld [vmem:[%s684_s3 + $0x40] sm:$0xff]  ;;  %v78_v23 = vld [vmem:[%s684_s3 + $0x48] sm:$0xff]  ;;  %p479_p0 = scmp.ne.s32.totalorder %s283_s23, %s478_s24  ;;  %p484_p2 = scmp.lt.s32.totalorder %s478_s24, %s478_s24 }
   0x6   :  { %33 = vadd.xlane.f32.xlu0 %v28_v1  ;;  %404 = vmatprep.subr.bf16.mxu0 %v403_v5  ;;  %v415_v21 = vpack.c.bf16 %v76_v20, %v75_v19  ;;  %v419_v24 = vpack.c.bf16 %v78_v23, %v77_v22  ;;  %v79_v25 = vld [vmem:[%s684_s3 + $0x50] sm:$0xff]  ;;  %v80_v26 = vld [vmem:[%s684_s3 + $0x58] sm:$0xff]  ;;  %v81_v27 = vld [vmem:[%s684_s3 + $0x60] sm:$0xff] }
   0x7   :  { %406 = vmatpush3.bf16.msra.mxu0 %v403_v5  ;;  %v423_v28 = vpack.c.bf16 %v80_v26, %v79_v25  ;;  %v82_v29 = vld [vmem:[%s684_s3 + $0x68] sm:$0xff]  ;;  %v83_v31 = vld [vmem:[%s684_s3 + $0x70] sm:$0xff]  ;;  %v84_v32 = vld [vmem:[%s684_s3 + $0x78] sm:$0xff]  ;;  %p485_p3 = por %p484_p2, %p483_p1 }
   0x8   :  { %408 = vmatprep.subr.bf16.mxu0 %v407_v7  ;;  %v427_v30 = vpack.c.bf16 %v82_v29, %v81_v27  ;;  %v431_v33 = vpack.c.bf16 %v84_v32, %v83_v31  ;;  %v177_v34 = vld [vmem:[%s686_s5] sm:$0xff]  ;;  %v178_v35 = vld [vmem:[%s686_s5 + $0x8] sm:$0xff]  ;;  %v179_v36 = vld [vmem:[%s686_s5 + $0x10] sm:$0xff] }
   0x9   :  { %v435_v37 = vpack.c.bf16 %v178_v35, %v177_v34  ;;  %v180_v38 = vld [vmem:[%s686_s5 + $0x18] sm:$0xff]  ;;  %v181_v40 = vld [vmem:[%s686_s5 + $0x20] sm:$0xff]  ;;  %v182_v41 = vld [vmem:[%s686_s5 + $0x28] sm:$0xff]  ;;  %p486_p4 = pnand %p485_p3, %p479_p0 }
   0xa   :  { %v439_v39 = vpack.c.bf16 %v180_v38, %v179_v36  ;;  %v443_v42 = vpack.c.bf16 %v182_v41, %v181_v40  ;;  %v293_v50 = vld [vmem:[%s682_s1] ss:$0 sm:$0xff]  ;;  %v183_v59 = vld [vmem:[%s686_s5 + $0x30] sm:$0xff]  ;;  %v184_v60 = vld [vmem:[%s686_s5 + $0x38] sm:$0xff] }
   0xb   :  { %410 = vmatpush3.bf16.msra.mxu0 %v407_v7  ;;  %436 = vmatprep.subr.bf16.mxu1 %v435_v37  ;;  %v294_v52 = vld [vmem:[%s683_s2] ss:$0 sm:$0xff]  ;;  %v447_v61 = vpack.c.bf16 %v184_v60, %v183_v59  ;;  %v186_v63 = vld [vmem:[%s686_s5 + $0x48] sm:$0xff]  ;;  %v188_v2 = vld [vmem:[%s686_s5 + $0x58] sm:$0xff] }
   0xc   :  { %412 = vmatprep.subr.bf16.mxu0 %v411_v18  ;;  %438 = vmatpush3.bf16.msra.mxu1 %v435_v37  ;;  %v185_v62 = vld [vmem:[%s686_s5 + $0x40] sm:$0xff]  ;;  %v190_v5 = vld [vmem:[%s686_s5 + $0x68] sm:$0xff]  ;;  %v191_v7 = vld [vmem:[%s686_s5 + $0x70] sm:$0xff] }
   0xd   :  { %440 = vmatprep.subr.bf16.mxu1 %v439_v39  ;;  %v189_v4 = vld [vmem:[%s686_s5 + $0x60] sm:$0xff] }
   0xe   :  { %v459_v6 = vpack.c.bf16 %v190_v5, %v189_v4  ;;  %v296_v25 = vld [vmem:[%s687_s6] ss:$0 sm:$0xff] }
   0xf   :  { %414 = vmatpush3.bf16.msra.mxu0 %v411_v18 }
  0x10   :  { %416 = vmatprep.subr.bf16.mxu0 %v415_v21  ;;  %442 = vmatpush3.bf16.msra.mxu1 %v439_v39 }
  0x11   :  { %444 = vmatprep.subr.bf16.mxu1 %v443_v42 }
  0x13   :  { %418 = vmatpush3.bf16.msra.mxu0 %v415_v21 }
  0x14   :  { %420 = vmatprep.subr.bf16.mxu0 %v419_v24  ;;  %446 = vmatpush3.bf16.msra.mxu1 %v443_v42 }
  0x15   :  { %448 = vmatprep.subr.bf16.mxu1 %v447_v61 }
  0x17   :  { %422 = vmatpush3.bf16.msra.mxu0 %v419_v24 }
  0x18   :  { %424 = vmatprep.subr.bf16.mxu0 %v423_v28  ;;  %450 = vmatpush3.bf16.msra.mxu1 %v447_v61 }
  0x1b   :  { %426 = vmatpush3.bf16.msra.mxu0 %v423_v28 }
  0x1c   :  { %428 = vmatprep.subr.bf16.mxu0 %v427_v30 }
  0x1f   :  { %430 = vmatpush3.bf16.msra.mxu0 %v427_v30 }
  0x20   :  { %432 = vmatprep.subr.bf16.mxu0 %v431_v33 }
  0x23   :  { %434 = vmatpush3.bf16.msra.mxu0 %v431_v33 }
  0x8f   :  { %v32_v8 = vpop.xlane.xlu0 %31 }
  0x90   :  { %v35_v9 = vmul.f32 0.0078125, %v32_v8  ;;  %v192_v8 = vld [vmem:[%s686_s5 + $0x78] sm:$0xff] }
  0x92   :  { %v563_v10 = vsub.f32 %v27_v0, %v35_v9  ;;  %v451_v0 = vpack.c.bf16 %v186_v63, %v185_v62  ;;  %v463_v9 = vpack.c.bf16 %v192_v8, %v191_v7 }
  0x93   :  { %v34_v11 = vpop.xlane.xlu0 %33 }
  0x94   :  { %v36_v12 = vmul.f32 0.0078125, %v34_v11  ;;  %v39_v13 = vmul.f32 %v563_v10, %v563_v10  ;;  %452 = vmatprep.subr.bf16.mxu1 %v451_v0 }
  0x95   :  { %454 = vmatpush3.bf16.msra.mxu1 %v451_v0 }
  0x96   :  { %v567_v14 = vsub.f32 %v28_v1, %v36_v12  ;;  %41 = vadd.xlane.f32.xlu1 %v39_v13  ;;  %v187_v1 = vld [vmem:[%s686_s5 + $0x50] sm:$0xff] }
  0x97   :  { %v455_v3 = vpack.c.bf16 %v188_v2, %v187_v1 }
  0x98   :  { %v40_v15 = vmul.f32 %v567_v14, %v567_v14 }
  0x99   :  { %456 = vmatprep.subr.bf16.mxu1 %v455_v3 }
  0x9a   :  { %43 = vadd.xlane.f32.xlu1 %v40_v15  ;;  %458 = vmatpush3.bf16.msra.mxu1 %v455_v3 }
  0x9b   :  { %460 = vmatprep.subr.bf16.mxu1 %v459_v6 }
  0x9e   :  { %462 = vmatpush3.bf16.msra.mxu1 %v459_v6 }
  0x9f   :  { %464 = vmatprep.subr.bf16.mxu1 %v463_v9 }
  0xa2   :  { %466 = vmatpush3.bf16.msra.mxu1 %v463_v9 }
 0x123   :  { %v42_v43 = vpop.xlane.xlu1 %41 }
 0x124   :  { %v45_v44 = vmul.f32 0.0078125, %v42_v43 }
 0x126   :  { %v47_v45 = vadd.f32 1e-05, %v45_v44 }
 0x127   :  { %v44_v46 = vpop.xlane.xlu1 %43 }
 0x128   :  { %470 = vrsqrt.f32 %v47_v45  ;;  %v46_v47 = vmul.f32 0.0078125, %v44_v46 }
 0x12a   :  { %v48_v48 = vadd.f32 1e-05, %v46_v47 }
 0x12c   :  { %472 = vrsqrt.f32 %v48_v48 }
 0x132   :  { %v471_v49 = vpop.eup %470 }
 0x133   :  { %v51_v51 = vmul.f32 %v471_v49, %v563_v10  ;;  %v295_v10 = vld [vmem:[%s685_s4] ss:$0 sm:$0xff] }
 0x135   :  { %v59_v53 = vmul.f32 %v293_v50, %v51_v51 }
 0x136   :  { %v473_v54 = vpop.eup %472 }
 0x137   :  { %v52_v55 = vmul.f32 %v473_v54, %v567_v14  ;;  %v67_v56 = vadd.f32 %v294_v52, %v59_v53 }
 0x139   :  { %v60_v57 = vmul.f32 %v293_v50, %v52_v55  ;;  %365 = vmatprep.mubr.f32.mxu0 %v67_v56 }
 0x13b   :  { %v68_v58 = vadd.f32 %v294_v52, %v60_v57 }
 0x13d   :  { %366 = vmatmul.mubr.f32.vlgmr.msra.gmra.mrb[0].mxu0 %v68_v58 }
 0x210   :  { %v367_v11 = vpop.f32.mrb[0].mxu0 }
 0x211   :  { %v164_v12 = vadd.f32 %v367_v11, %v295_v10  ;;  %v158_v13 = vpop.f32.mrb[1].mxu0 }
 0x212   :  { %v159_v14 = vadd.f32 %v295_v10, %v158_v13 }
 0x213   :  { %v170_v15 = vmul.f32 0.70710677, %v164_v12  ;;  %v168_v22 = vmul.f32 0.5, %v164_v12 }
 0x214   :  { %v169_v16 = vmul.f32 0.70710677, %v159_v14  ;;  %v167_v20 = vmul.f32 0.5, %v159_v14 }
 0x215   :  { %474 = verf.f32 %v170_v15 }
 0x216   :  { %476 = verf.f32 %v169_v16 }
 0x21f   :  { %v475_v17 = vpop.eup %474 }
 0x220   :  { %v477_v18 = vpop.eup %476  ;;  %v174_v19 = vadd.f32 1.0, %v475_v17 }
 0x221   :  { %v173_v21 = vadd.f32 1.0, %v477_v18 }
 0x222   :  { %v176_v24 = vmul.f32 %v174_v19, %v168_v22 }
 0x223   :  { %v175_v23 = vmul.f32 %v173_v21, %v167_v20 }
 0x225   :  { %400 = vmatprep.mubr.f32.mxu1 %v175_v23 }
 0x226   :  { %401 = vmatmul.mubr.f32.vlgmr.msra.gmra.mrb[0].mxu1 %v176_v24 }
 0x2f9   :  { %v402_v26 = vpop.f32.mrb[0].mxu1 }
 0x2fa   :  { %v272_v27 = vadd.f32 %v402_v26, %v296_v25  ;;  %v266_v28 = vpop.f32.mrb[1].mxu1 }
 0x2fb   :  { %v267_v29 = vadd.f32 %v296_v25, %v266_v28 }
 0x2fc   :  { %276 = vst [vmem:[#allocation2 + $0x8] sm:$0xff] %v272_v27 }
 0x2fd   :  { %275 = vst [vmem:[#allocation2] sm:$0xff] %v267_v29 }
 0x2fe   :  { %489 = shalt.err (!%p486_p4)
}
 0x2ff   :  { %s490_s6 = scalar_lea.hbm %s688_s7, 256 }
 0x300   :  { %p491_p5 = scmp.ne.s32.totalorder %s688_s7, %s490_s6  ;;  %p494_p6 = scmp.lt.u32.totalorder %s490_s6, %s688_s7 }
 0x302   :  { %p496_p7 = pnand %p494_p6, %p491_p5 }
 0x304   :  { %499 = shalt.err (!%p496_p7)
}
 0x305   :  { %s503_s2 = smov 128   ;;  %s504_s30 = smov 8  }
 0x306   :  { %288 = dma.vmem_to_hbm [thread:$0]  %s283_s23, 256, %s688_s7, [#allocation3], %s503_s2, %s503_s2, %s504_s30  }
 0x307   :  { %500 = dma.done.wait [#allocation3], 256  }
 0x308   :  { %501 = vsyncadd [#allocation3], 4294967040 }
 0x309   :  { %292 = vsyncpa [#allocation3], 1 }

</bundles_post_ra>
